<compile_context>
chip_gen: v5e
topology: v5e:2x2
jax: 0.10.0
libtpu: 0.0.40
codegen_flags: <defaults>
</compile_context>

<pallas_src>
from functools import partial

import jax
import jax.numpy as jnp
from jax import lax
from jax.experimental import pallas as pl
from jax.experimental.pallas import tpu as pltpu


# --------------------------------------------------------------------------
# 1. RMSNorm  (channel-wise L2 normalize * g * sqrt(C), NCHW)
# --------------------------------------------------------------------------
def _rmsnorm_kernel(x_ref, g_ref, o_ref):
    # x_ref: (1, C, THW), g_ref: (1, C, 1) [already scaled by sqrt(C)]
    x = x_ref[...].astype(jnp.float32)
    g = g_ref[...].astype(jnp.float32)
    sumsq = jnp.sum(x * x, axis=1, keepdims=True)      # (1, 1, THW)
    # rsqrt(max(sumsq, eps^2)) == 1 / max(||x||, eps), eps = 1e-12
    inv = lax.rsqrt(jnp.maximum(sumsq, 1e-24))
    o_ref[...] = (x * (inv * g)).astype(o_ref.dtype)


def _choose_hw_tile(hw, c, itemsize, vmem_budget_bytes=8 << 20):
    """Lane tile (multiple of 128) so double-buffered in+out fits a budget
    that is comfortably inside default scoped VMEM on v5e/v6e/v7x."""
    max_tile = (vmem_budget_bytes // (4 * c * itemsize)) // 128 * 128
    max_tile = int(max(128, min(max_tile, 2048)))
    if hw <= max_tile:
        return hw                       # full extent is always legal
    for cand in range(max_tile, 127, -128):
        if hw % cand == 0:
            return cand                 # even division -> no ragged block
    return max_tile                     # ragged final block; Pallas masks it


def rmsnorm(x, g):
    """x: (N, C, H, W), g: (1, C, 1, 1) -> (N, C, H, W)."""
    n, c, h, w = x.shape
    hw = h * w
    x3 = x.reshape(n, c, hw)
    g3 = g.reshape(1, c, 1).astype(jnp.float32) * (float(c) ** 0.5)

    itemsize = jnp.dtype(x.dtype).itemsize
    thw = _choose_hw_tile(hw, c, itemsize)
    n_hw_tiles = pl.cdiv(hw, thw)

    cost = pl.CostEstimate(
        flops=3 * n * c * hw,
        transcendentals=n * hw,
        bytes_accessed=2 * n * c * hw * itemsize,
    )

    out3 = pl.pallas_call(
        _rmsnorm_kernel,
        out_shape=jax.ShapeDtypeStruct((n, c, hw), x.dtype),
        grid_spec=pltpu.PrefetchScalarGridSpec(
            num_scalar_prefetch=0,
            grid=(n, n_hw_tiles),
            in_specs=[
                pl.BlockSpec((1, c, thw), lambda i, j: (i, 0, j)),
                pl.BlockSpec((1, c, 1), lambda i, j: (0, 0, 0)),
            ],
            out_specs=pl.BlockSpec((1, c, thw), lambda i, j: (i, 0, j)),
        ),
        compiler_params=pltpu.CompilerParams(
            dimension_semantics=("parallel", "parallel"),
        ),
        cost_estimate=cost,
    )(x3, g3)
    return out3.reshape(n, c, h, w)


def rmsnorm_reference(x, g):
    c = x.shape[1]
    norm = jnp.sqrt(jnp.sum(x.astype(jnp.float32) ** 2, axis=1, keepdims=True))
    denom = jnp.maximum(norm, 1e-12)
    return (x.astype(jnp.float32) / denom * g * (float(c) ** 0.5)).astype(x.dtype)


# --------------------------------------------------------------------------
# 2. Fused GroupNorm + (scale+1, shift) + SiLU  (the `Block` post-conv path)
# --------------------------------------------------------------------------
def _groupnorm_silu_kernel(x_ref, a_ref, b_ref, o_ref, *, eps):
    # x_ref: (1, Cg, HW)  a_ref/b_ref: (1, Cg, 1)  (affine already folded)
    x = x_ref[0].astype(jnp.float32)          # (Cg, HW)
    a = a_ref[0].astype(jnp.float32)          # (Cg, 1)
    b = b_ref[0].astype(jnp.float32)          # (Cg, 1)
    mean = jnp.mean(x)
    xc = x - mean
    var = jnp.mean(xc * xc)
    inv = lax.rsqrt(var + eps)
    y = xc * inv * a + b
    o_ref[...] = (y * jax.nn.sigmoid(y))[None].astype(o_ref.dtype)


def groupnorm_scale_shift_silu(x, gamma, beta, scale=None, shift=None,
                               groups=8, eps=1e-5):
    """SiLU( GroupNorm(x) * (scale + 1) + shift ).  x: (N, C, H, W)."""
    n, c, h, w = x.shape
    assert c % groups == 0
    cg = c // groups
    hw = h * w

    gamma = gamma.reshape(1, c).astype(jnp.float32)
    beta = beta.reshape(1, c).astype(jnp.float32)
    scale = (jnp.zeros((n, c), jnp.float32) if scale is None
             else scale.reshape(n, c).astype(jnp.float32))
    shift = (jnp.zeros((n, c), jnp.float32) if shift is None
             else shift.reshape(n, c).astype(jnp.float32))
    # Fold GroupNorm affine and the time-embedding modulation into one FMA.
    eff_scale = gamma * (scale + 1.0)                  # (n, c)
    eff_shift = beta * (scale + 1.0) + shift           # (n, c)

    x3 = x.reshape(n * groups, cg, hw)
    a3 = eff_scale.reshape(n * groups, cg, 1)
    b3 = eff_shift.reshape(n * groups, cg, 1)

    # TODO(synk): for very large H*W a two-pass (stats, then normalize) tiling
    # over the spatial axis would be needed; one (image, group) tile per grid
    # step is fine at UNet feature-map sizes.
    out3 = pl.pallas_call(
        partial(_groupnorm_silu_kernel, eps=float(eps)),
        out_shape=jax.ShapeDtypeStruct((n * groups, cg, hw), x.dtype),
        grid_spec=pltpu.PrefetchScalarGridSpec(
            num_scalar_prefetch=0,
            grid=(n * groups,),
            in_specs=[
                pl.BlockSpec((1, cg, hw), lambda i: (i, 0, 0)),
                pl.BlockSpec((1, cg, 1), lambda i: (i, 0, 0)),
                pl.BlockSpec((1, cg, 1), lambda i: (i, 0, 0)),
            ],
            out_specs=pl.BlockSpec((1, cg, hw), lambda i: (i, 0, 0)),
        ),
        compiler_params=pltpu.CompilerParams(
            dimension_semantics=("parallel",),
        ),
    )(x3, a3, b3)
    return out3.reshape(n, c, h, w)


def groupnorm_silu_reference(x, gamma, beta, scale, shift, groups=8, eps=1e-5):
    n, c, h, w = x.shape
    xg = x.reshape(n, groups, -1).astype(jnp.float32)
    mean = xg.mean(-1, keepdims=True)
    var = ((xg - mean) ** 2).mean(-1, keepdims=True)
    xhat = ((xg - mean) / jnp.sqrt(var + eps)).reshape(n, c, h, w)
    y = xhat * gamma.reshape(1, c, 1, 1) + beta.reshape(1, c, 1, 1)
    y = y * (scale.reshape(n, c, 1, 1) + 1.0) + shift.reshape(n, c, 1, 1)
    return (y * jax.nn.sigmoid(y)).astype(x.dtype)


# --------------------------------------------------------------------------
# 3. LinearAttention core (softmaxes + two matmuls per (batch, head))
# --------------------------------------------------------------------------
def _linear_attention_kernel(q_ref, k_ref, v_ref, o_ref, *, scale):
    q = q_ref[0].astype(jnp.float32)          # (D, N)
    k = k_ref[0].astype(jnp.float32)          # (D, N)
    v = v_ref[0].astype(jnp.float32)          # (D, N)
    q = jax.nn.softmax(q, axis=0) * scale     # softmax over head-dim
    k = jax.nn.softmax(k, axis=1)             # softmax over spatial
    # context[d, e] = sum_n k[d, n] * v[e, n]
    context = lax.dot_general(k, v, (((1,), (1,)), ((), ())),
                              preferred_element_type=jnp.float32)   # (D, D)
    # out[e, n] = sum_d context[d, e] * q[d, n]
    out = lax.dot_general(context, q, (((0,), (0,)), ((), ())),
                          preferred_element_type=jnp.float32)       # (D, N)
    o_ref[...] = out[None].astype(o_ref.dtype)


def linear_attention(q, k, v):
    """q, k, v: (B, heads, dim_head, HW) -> (B, heads, dim_head, HW)."""
    b, h, d, n = q.shape
    scale = float(d) ** -0.5
    qf, kf, vf = (t.reshape(b * h, d, n) for t in (q, k, v))
    out = pl.pallas_call(
        partial(_linear_attention_kernel, scale=scale),
        out_shape=jax.ShapeDtypeStruct((b * h, d, n), q.dtype),
        grid_spec=pltpu.PrefetchScalarGridSpec(
            num_scalar_prefetch=0,
            grid=(b * h,),
            in_specs=[pl.BlockSpec((1, d, n), lambda i: (i, 0, 0))] * 3,
            out_specs=pl.BlockSpec((1, d, n), lambda i: (i, 0, 0)),
        ),
        compiler_params=pltpu.CompilerParams(
            dimension_semantics=("parallel",),
        ),
    )(qf, kf, vf)
    return out.reshape(b, h, d, n)


def linear_attention_reference(q, k, v):
    d = q.shape[2]
    scale = float(d) ** -0.5
    qf = jax.nn.softmax(q.astype(jnp.float32), axis=-2) * scale
    kf = jax.nn.softmax(k.astype(jnp.float32), axis=-1)
    context = jnp.einsum('bhdn,bhen->bhde', kf, v.astype(jnp.float32))
    out = jnp.einsum('bhde,bhdn->bhen', context, qf)
    return out.astype(q.dtype)


# --------------------------------------------------------------------------
# 4. Full Attention core (scaled dot-product softmax attention per head)
# --------------------------------------------------------------------------
def _attention_kernel(q_ref, k_ref, v_ref, o_ref, *, scale):
    q = q_ref[0].astype(jnp.float32)          # (N, D)
    k = k_ref[0].astype(jnp.float32)          # (N, D)
    v = v_ref[0].astype(jnp.float32)          # (N, D)
    s = lax.dot_general(q, k, (((1,), (1,)), ((), ())),
                        preferred_element_type=jnp.float32) * scale  # (N, N)
    p = jax.nn.softmax(s, axis=-1)
    out = jnp.dot(p, v, preferred_element_type=jnp.float32)          # (N, D)
    o_ref[...] = out[None].astype(o_ref.dtype)


def attention(q, k, v):
    """q, k, v: (B, heads, HW, dim_head) -> (B, heads, HW, dim_head)."""
    b, h, n, d = q.shape
    scale = float(d) ** -0.5
    qf, kf, vf = (t.reshape(b * h, n, d) for t in (q, k, v))
    # TODO(synk): a flash-style (tq, tk) tiled variant is needed for very
    # large HW; full attention only runs at the lowest UNet resolution.
    out = pl.pallas_call(
        partial(_attention_kernel, scale=scale),
        out_shape=jax.ShapeDtypeStruct((b * h, n, d), q.dtype),
        grid_spec=pltpu.PrefetchScalarGridSpec(
            num_scalar_prefetch=0,
            grid=(b * h,),
            in_specs=[pl.BlockSpec((1, n, d), lambda i: (i, 0, 0))] * 3,
            out_specs=pl.BlockSpec((1, n, d), lambda i: (i, 0, 0)),
        ),
        compiler_params=pltpu.CompilerParams(
            dimension_semantics=("parallel",),
        ),
    )(qf, kf, vf)
    return out.reshape(b, h, n, d)


def attention_reference(q, k, v):
    d = q.shape[-1]
    s = jnp.einsum('bhnd,bhmd->bhnm', q.astype(jnp.float32),
                   k.astype(jnp.float32)) * (float(d) ** -0.5)
    p = jax.nn.softmax(s, axis=-1)
    return jnp.einsum('bhnm,bhmd->bhnd', p, v.astype(jnp.float32)).astype(q.dtype)


# TODO(synk): the UNet's 7x7/3x3/1x1 convolutions, pixel-unshuffle downsample,
# nearest-neighbor upsample and the tiny time-embedding MLP are left to XLA.

if __name__ == "__main__":
    key = jax.random.PRNGKey(0)
    keys = jax.random.split(key, 12)

    # --- 1. RMSNorm: primary small-shape check (single-tile path) ----------
    N, C, H, W = 2, 4, 16, 16
    x = jax.random.normal(keys[0], (N, C, H, W), dtype=jnp.float32)
    g = jnp.ones((1, C, 1, 1), dtype=jnp.float32)
    out = jax.block_until_ready(rmsnorm(x, g))
    assert out.shape == (N, C, H, W)
    assert jnp.allclose(out, rmsnorm_reference(x, g), atol=1e-5, rtol=1e-5)

    # --- 1b. RMSNorm: tiled multi-block grid path ---------------------------
    x2 = jax.random.normal(keys[1], (2, 32, 64, 64), dtype=jnp.float32)
    g2 = jnp.ones((1, 32, 1, 1), dtype=jnp.float32)
    out2 = jax.block_until_ready(rmsnorm(x2, g2))
    assert jnp.allclose(out2, rmsnorm_reference(x2, g2), atol=1e-5, rtol=1e-5)

    # --- 2. Fused GroupNorm + scale/shift + SiLU (Block.forward) -----------
    Ng, Cg_, Hg, Wg, G = 2, 32, 16, 16, 8
    xb = jax.random.normal(keys[2], (Ng, Cg_, Hg, Wg), dtype=jnp.float32)
    gamma = 1.0 + 0.1 * jax.random.normal(keys[3], (Cg_,), dtype=jnp.float32)
    beta = 0.1 * jax.random.normal(keys[4], (Cg_,), dtype=jnp.float32)
    sc = 0.1 * jax.random.normal(keys[5], (Ng, Cg_), dtype=jnp.float32)
    sh = 0.1 * jax.random.normal(keys[6], (Ng, Cg_), dtype=jnp.float32)
    outb = jax.block_until_ready(
        groupnorm_scale_shift_silu(xb, gamma, beta, sc, sh, groups=G))
    refb = groupnorm_silu_reference(xb, gamma, beta, sc, sh, groups=G)
    assert jnp.allclose(outb, refb, atol=1e-4, rtol=1e-4)

    # --- 3. LinearAttention core --------------------------------------------
    B, Hd, D, Nn = 2, 4, 32, 64   # heads=4, dim_head=32, HW = 8*8
    ql = jax.random.normal(keys[7], (B, Hd, D, Nn), dtype=jnp.float32)
    kl = jax.random.normal(keys[8], (B, Hd, D, Nn), dtype=jnp.float32)
    vl = jax.random.normal(keys[9], (B, Hd, D, Nn), dtype=jnp.float32)
    outl = jax.block_until_ready(linear_attention(ql, kl, vl))
    assert jnp.allclose(outl, linear_attention_reference(ql, kl, vl),
                        atol=1e-4, rtol=1e-4)

    # --- 4. Full Attention core ---------------------------------------------
    qa = jax.random.normal(keys[10], (B, Hd, Nn, D), dtype=jnp.float32)
    ka = jax.random.normal(keys[11], (B, Hd, Nn, D), dtype=jnp.float32)
    va = jax.random.normal(keys[0], (B, Hd, Nn, D), dtype=jnp.float32)
    outa = jax.block_until_ready(attention(qa, ka, va))
    assert jnp.allclose(outa, attention_reference(qa, ka, va),
                        atol=1e-4, rtol=1e-4)

    print("KERNEL_OK")
</pallas_src>

<mosaic_0001>
module attributes {stable_mosaic.version = 11 : i64} {
  func.func @_rmsnorm_kernel(%arg0: i32, %arg1: i32, %arg2: memref<1x4x256xf32, #tpu.memory_space<vmem>>, %arg3: memref<1x4x1xf32, #tpu.memory_space<vmem>>, %arg4: memref<1x4x256xf32, #tpu.memory_space<vmem>>) attributes {dimension_semantics = [#tpu.dimension_semantics<parallel>, #tpu.dimension_semantics<parallel>], iteration_bounds = array<i64: 2, 1>, scalar_prefetch = 0 : i64, scratch_operands = 0 : i64, tpu.core_type = #tpu.core_type<tc>, window_params = [{transform_indices = @transform_0, window_bounds = array<i64: 1, 4, 256>}, {pipeline_mode = #tpu.pipeline_mode<synchronous>, transform_indices = @transform_1, window_bounds = array<i64: 1, 4, 1>}, {transform_indices = @transform_2, window_bounds = array<i64: 1, 4, 256>}]} {
    %c0 = arith.constant 0 : index
    %c0_0 = arith.constant 0 : index
    %c0_1 = arith.constant 0 : index
    %0 = vector.load %arg2[%c0, %c0_0, %c0_1] : memref<1x4x256xf32, #tpu.memory_space<vmem>>, vector<1x4x256xf32>
    %c0_2 = arith.constant 0 : index
    %c0_3 = arith.constant 0 : index
    %c0_4 = arith.constant 0 : index
    %1 = vector.load %arg3[%c0_2, %c0_3, %c0_4] : memref<1x4x1xf32, #tpu.memory_space<vmem>>, vector<1x4x1xf32>
    %2 = arith.mulf %0, %0 : vector<1x4x256xf32>
    %cst = arith.constant dense<0.000000e+00> : vector<1x256xf32>
    %3 = vector.multi_reduction <add>, %2, %cst [1] : vector<1x4x256xf32> to vector<1x256xf32>
    %4 = vector.shape_cast %3 : vector<1x256xf32> to vector<1x1x256xf32>
    %cst_5 = arith.constant 1.000000e-24 : f32
    %5 = vector.broadcast %cst_5 : f32 to vector<1x1x256xf32>
    %6 = arith.maximumf %4, %5 : vector<1x1x256xf32>
    %7 = math.rsqrt %6 : vector<1x1x256xf32>
    %8 = vector.broadcast %7 : vector<1x1x256xf32> to vector<1x4x256xf32>
    %9 = vector.broadcast %1 : vector<1x4x1xf32> to vector<1x4x256xf32>
    %10 = arith.mulf %8, %9 : vector<1x4x256xf32>
    %11 = arith.mulf %0, %10 : vector<1x4x256xf32>
    %c0_6 = arith.constant 0 : index
    %c0_7 = arith.constant 0 : index
    %c0_8 = arith.constant 0 : index
    %12 = vector.load %arg4[%c0_6, %c0_7, %c0_8] : memref<1x4x256xf32, #tpu.memory_space<vmem>>, vector<1x4x256xf32>
    tpu.vector_store %arg4[%c0_6, %c0_7, %c0_8], %11 {strides = array<i32>} : memref<1x4x256xf32, #tpu.memory_space<vmem>>, vector<1x4x256xf32>,
    return
  }
  func.func @transform_0(%arg0: i32, %arg1: i32) -> (i32, i32, i32) {
    %c0_i32 = arith.constant 0 : i32
    %c0_i32_0 = arith.constant 0 : i32
    return %arg0, %c0_i32, %arg1 : i32, i32, i32
  }
  func.func @transform_1(%arg0: i32, %arg1: i32) -> (i32, i32, i32) {
    %c0_i32 = arith.constant 0 : i32
    %c0_i32_0 = arith.constant 0 : i32
    %c0_i32_1 = arith.constant 0 : i32
    %c0_i32_2 = arith.constant 0 : i32
    return %c0_i32, %c0_i32_0, %c0_i32_1 : i32, i32, i32
  }
  func.func @transform_2(%arg0: i32, %arg1: i32) -> (i32, i32, i32) {
    %c0_i32 = arith.constant 0 : i32
    %c0_i32_0 = arith.constant 0 : i32
    return %arg0, %c0_i32, %arg1 : i32, i32, i32
  }
}

</mosaic_0001>

<bundles_post_ra>
// kernel: tpu_custom_call.1
= control target key start
LH: loop header
LB: loop body
LE: loop exit
PB: predicated region body
PF: predicated region fallthrough
CT: control target
= control target key end

     0   :  { %7 = vsyncpa [#allocation3], 0  ;;  %s690_s0 = inlined_call_operand.hbm [shape: f32[2,4,256], index: 0, kind: input, shape index: {}]   ;;  %s691_s1 = inlined_call_operand.vmem [shape: f32[1,4,1], index: 1, kind: input, shape index: {}]   ;;  %s692_s2 = inlined_call_operand.hbm [shape: f32[2,4,256], index: 2, kind: output, shape index: {}]  }
   0x1   :  { %9 = vsyncpa [#allocation3 + $0x1], 0 }
   0x2   :  { %10 = vsyncpa [#allocation4], 0 }
   0x3   :  { %12 = vsyncpa [#allocation4 + $0x1], 0  ;;  %s560_s9 = smov 0   ;;  %s562_s10 = smov 0  }
   0x4   :  { %s564_s11 = smov 0   ;;  %s566_s12 = smov 0  }
   0x5   :  { %s568_s13 = smov 0   ;;  %s570_s14 = smov 0  }
   0x6 LB: > { %s345_s15 = sadd.s32 4294967295, %s542_s14   ;;  %s346_s16 = sadd.s32 4294967294, %s542_s14   ;;  %s542_s14 = sphi %s570_s14, %s18_s14   ;;  %s538_s13 = sphi %s568_s13, %s701_s13   ;;  %s534_s12 = sphi %s566_s12, %s700_s12   ;;  %s530_s11 = sphi %s564_s11, %s699_s11   ;;  %s526_s10 = sphi %s562_s10, %s698_s10   ;;  %s522_s9 = sphi %s560_s9, %s697_s9  }
   0x7   : > { %s30_s17 = sadd.s32 1, %s538_s13  ;;  %s39_s18 = sadd.s32 1, %s530_s11 }
   0x8   : > { %p32_p0 = scmp.ge.s32.totalorder %s30_s17, 2  ;;  %p46_p1 = scmp.ne.s32.totalorder %s530_s11, %s526_s10 }
   0x9   : > { %p47_p2 = scmp.eq.s32.totalorder %s542_s14, 0  ;;  %p52_p3 = scmp.ne.s32.totalorder %s526_s10, %s522_s9 }
   0xa   : > { %s703_s17 = smov (%p32_p0, %s30_s17), 0  ;;  %p53_p5 = scmp.eq.s32.totalorder %s345_s15, 0 }
   0xb   : > { %p601_p4 = por %p47_p2, %p46_p1  ;;  %s34_s20 = ssub.s32 %s538_s13, %s703_s17 }
   0xc   : > { %p99_p6 = scmp.eq.s32.totalorder %s345_s15, 1  ;;  %p37_p7 = scmp.eq.s32.totalorder %s34_s20, 0 }
   0xd   : > { %p607_p8 = por %p53_p5, %p52_p3  ;;  %p105_p10 = scmp.eq.s32.totalorder %s346_s16, 1 }
   0xe   : > { %p611_p9 = por %p99_p6, %p46_p1  ;;  %p348_p12 = scmp.ge.s32.totalorder %s542_s14, 2 }
   0xf   : > { %s616_s23 = scalar_select %p37_p7, %s530_s11, %s39_s18  }
  0x10   : > { %p618_p11 = por %p105_p10, %p52_p3  ;;  %p374_p13 = scmp.lt.s32.totalorder %s542_s14, 2 }
  0x11   : > { %s128_s25 = sand.u32 1, %s530_s11   ;;  %s360_s27 = sshll.u32 %s538_s13, 3 }
  0x12   : > { %s349_s26 = sshll.u32 %s128_s25, 3  ;;  %s139_s30 = scalar_lea.hbm %s690_s0, %s360_s27 }
  0x13   : > { %s132_s3 = scalar_lea.vmem [#allocation2], %s349_s26  ;;  %s141_s5 = sshll.u32 %s139_s30, 4  ;;  %s142_s5 = int_to_ptr.hbm [resolvable:$true] %s141_s5 }
  0x14   : > { %s143_s4 = sshll.u32 %s132_s3, 4  ;;  %p367_p0 = pnand %p374_p13, %p601_p4  ;;  %s144_s4 = int_to_ptr.vmem [resolvable:$true] %s143_s4 }
  0x15   : > { %p352_p1 = scmp.ge.s32.totalorder %s542_s14, 1  ;;  %p148_p2 = scmp.lt.s32.totalorder %s542_s14, 3 }
  0x16   : > { %s129_s6 = scalar_lea.sflag [#allocation3], %s128_s25 }
  0x17   : > { %369 = dma.hbm_to_vmem [thread:$0]  (!%p367_p0), %s142_s5, 128, %s144_s4, %s129_s6  }
  0x18   : > { %p149_p3 = pnand %p352_p1, %p148_p2 }
  0x19   : > { %s634_s7 = sand.u32 (!%p149_p3), 1, %s526_s10  }
  0x1a   : > { %152 = sbr.rel (%p149_p3) target bundleno = 159 (0x9f), region = 28  ;;  %s353_s8 = sshll.u32 (!%p149_p3), %s634_s7, 3 }
  0x1b   : > { %s155_s15 = scalar_lea.sflag (!%p149_p3), [#allocation3], %s634_s7  ;;  %s158_s16 = scalar_lea.vmem (!%p149_p3), [#allocation2], %s353_s8 }
  0x1f   : > { %513 = dma.done.wait (%p607_p8), %s155_s15, 128  }
  0x20   : > { %515 = vsyncadd (%p607_p8), %s155_s15, 4294967168  ;;  %v544_v0 = vmov 0   ;;  %v183_v1 = vld [vmem:[%s691_s1] sm:$0xf]  ;;  %v182_v2 = vld [vmem:[%s158_s16] sm:$0xff]  ;;  %vm191_vm0 = vcmask 1043456  }
  0x21   : > { %425 = vset.pattern.permute.xlu0 %v544_v0  ;;  %v184_v3 = vmul.f32 %v182_v2, %v182_v2  ;;  %s361_s20 = sshll.u32 %s534_s12, 3  ;;  %s179_s27 = scalar_lea.vmem [#allocation5], %s353_s8 }
  0x22   : > { %230 = vperm.xlu0 %425, %v183_v1   ;;  %s256_s26 = scalar_lea.hbm %s692_s2, %s361_s20  ;;  %s258_s28 = sshll.u32 %s179_s27, 4  ;;  %s259_s28 = int_to_ptr.vmem [resolvable:$true] %s258_s28 }
  0x23   : > { %186 = vst [vmem:[#allocation1] ss:$2 sm:$0xff] %v184_v3  ;;  %s260_s29 = sshll.u32 %s256_s26, 4  ;;  %s243_s12 = scalar_lea.sflag [#allocation4], %s634_s7  ;;  %s261_s29 = int_to_ptr.hbm [resolvable:$true] %s260_s29 }
  0x24   : > { %s474_s30 = sshra.s32 %s261_s29, 4  ;;  %s480_s6 = scalar_lea.hbm %s692_s2, 16  ;;  %s475_s30 = int_to_ptr.hbm [resolvable:$true] %s474_s30 }
  0x25   : > { %s476_s3 = scalar_lea.hbm %s475_s30, 8  ;;  %p481_p7 = scmp.lt.s32.totalorder %s475_s30, %s692_s2 }
  0x26   : > { %p477_p4 = scmp.ne.s32.totalorder %s475_s30, %s476_s3  ;;  %p482_p8 = scmp.lt.s32.totalorder %s480_s6, %s476_s3 }
  0x28   : > { %p478_p5 = pnand %p477_p4, %p611_p9  ;;  %p483_p10 = por %p482_p8, %p481_p7 }
  0x2a   : > { %v188_v4 = vld.sshfl [vmem:[#allocation1 + $0x8] sm:$0xff pattern:$0x75316420]  ;;  %v187_v5 = vld.sshfl [vmem:[#allocation1] sm:$0xff pattern:$0x75316420]  ;;  %p479_p6 = pneg %p478_p5 }
  0x2b   : > { %v199_v6 = vsel %vm191_vm0, %v188_v4, 0.0  ;;  %v192_v7 = vsel %vm191_vm0, %v187_v5, 0.0 }
  0x2c   : > { %v200_v8 = vrot.slane %v199_v6, 4  ;;  %v193_v9 = vrot.slane %v192_v7, 4  ;;  %p484_p13 = pnand %p483_p10, %p479_p6 }
  0x2e   : > { %v201_v10 = vadd.f32 %v200_v8, %v199_v6  ;;  %v194_v11 = vadd.f32 %v193_v9, %v192_v7 }
  0x30   : > { %v202_v12 = vrot.slane %v201_v10, 2  ;;  %v195_v13 = vrot.slane %v194_v11, 2 }
  0x32   : > { %v203_v14 = vadd.f32 %v202_v12, %v201_v10  ;;  %v196_v15 = vadd.f32 %v195_v13, %v194_v11 }
  0x34   : > { %v204_v16 = vrot.slane %v203_v14, 1  ;;  %v197_v17 = vrot.slane %v196_v15, 1 }
  0x36   : > { %v205_v18 = vadd.f32 %v204_v16, %v203_v14  ;;  %v198_v19 = vadd.f32 %v197_v17, %v196_v15 }
  0x38   : > { %v207_v20 = vmax.f32 %v205_v18, 1e-24  ;;  %v206_v21 = vmax.f32 %v198_v19, 1e-24 }
  0x3a   : > { %426 = vrsqrt.f32 %v207_v20  ;;  %vm224_vm1 = vweird.f32 %v207_v20  ;;  %vm214_vm3 = vweird.f32 %v206_v21 }
  0x3b   : > { %428 = vrsqrt.f32 %v206_v21 }
  0x40   : > { %v427_v22 = vpop.eup %426 }
  0x41   : > { %v429_v23 = vpop.eup %428  ;;  %v219_v24 = vmul.f32 %v427_v22, %v207_v20  ;;  %vm225_vm2 = vweird.f32 %v427_v22 }
  0x42   : > { %v209_v25 = vmul.f32 %v429_v23, %v206_v21  ;;  %vm215_vm4 = vweird.f32 %v429_v23  ;;  %vm226_vm5 = vmor %vm224_vm1, %vm225_vm2 }
  0x43   : > { %v220_v26 = vmul.f32 %v427_v22, %v219_v24  ;;  %vm216_vm6 = vmor %vm214_vm3, %vm215_vm4 }
  0x44   : > { %v210_v27 = vmul.f32 %v429_v23, %v209_v25 }
  0x45   : > { %v221_v28 = vmul.f32 0.5, %v220_v26 }
  0x46   : > { %v211_v29 = vmul.f32 0.5, %v210_v27 }
  0x47   : > { %v222_v30 = vsub.f32 1.5, %v221_v28 }
  0x48   : > { %v212_v31 = vsub.f32 1.5, %v211_v29 }
  0x49   : > { %v223_v32 = vmul.f32 %v427_v22, %v222_v30 }
  0x4a   : > { %v213_v33 = vmul.f32 %v429_v23, %v212_v31 }
  0x4b   : > { %v227_v34 = vsel %vm226_vm5, %v427_v22, %v223_v32 }
  0x4c   : > { %v217_v36 = vsel %vm216_vm6, %v429_v23, %v213_v33 }
  0x94   : > { %v231_v35 = vpop.permute.xlu0 %230 }
  0x95   : > { %v234_v37 = vmul.f32 %v231_v35, %v227_v34  ;;  %v233_v38 = vmul.f32 %v231_v35, %v217_v36 }
  0x97   : > { %v237_v39 = vrot.slane %v234_v37, 4 }
  0x99   : > { %v238_v40 = vsel %vm191_vm0, %v233_v38, %v237_v39 }
  0x9a   : > { %v240_v41 = vmul.f32 %v238_v40, %v182_v2 }
  0x9c   : > { %241 = vst [vmem:[%s179_s27] sm:$0xff] %v240_v41 }
  0x9d   : > { %487 = shalt.err (!%p484_p13)
}
  0x9e   : > { %364 = dma.vmem_to_hbm [thread:$0]  (%p611_p9), %s259_s28, 128, %s261_s29, %s243_s12  }
  0x9f PF: > { %s272_s7 = sand.u32 1, %s522_s9   ;;  %p371_p0 = pnand %p348_p12, %p618_p11 }
  0xa0   : > { %s273_s16 = scalar_lea.sflag [#allocation4], %s272_s7 }
  0xa1   : > { %p372_p1 = pneg %p371_p0 }
  0xa3   : > { %517 = dma.done.wait (%p372_p1), %s273_s16, 128  }
  0xa4   : > { %519 = vsyncadd (%p372_p1), %s273_s16, 4294967168  ;;  %s18_s14 = sadd.s32 1, %s542_s14   ;;  %s697_s9 = smov %s526_s10 }
  0xa5   : > { %p15_p2 = scmp.ge.s32.totalorder %s18_s14, 4   ;;  %s698_s10 = smov %s530_s11 }
  0xa6   : > { %s699_s11 = smov %s616_s23  ;;  %s700_s12 = smov %s538_s13 }
  0xa7   : > { %s701_s13 = smov %s703_s17  ;;  %17 = sbr.rel (!%p15_p2) target bundleno = 6 (0x6), region = 73 }
  0xac   :  { %279 = vsyncpa [#allocation3], 1 }
  0xad   :  { %281 = vsyncpa [#allocation3 + $0x1], 1 }
  0xae   :  { %282 = vsyncpa [#allocation4], 1 }
  0xaf   :  { %284 = vsyncpa [#allocation4 + $0x1], 1 }

</bundles_post_ra>
